<compile_context>
chip_gen: v7x
topology: tpu7x:2x2x1
jax: 0.10.0
libtpu: 0.0.40
codegen_flags: <defaults>
</compile_context>

<pallas_src>
import jax
import jax.numpy as jnp
from jax.experimental import pallas as pl
from jax.experimental.pallas import tpu as pltpu


LANE = 128
SUBLANE = 8


def _round_up(x, m):
    return ((x + m - 1) // m) * m


def mlp_kernel(x_ref, w1_ref, b1_ref, w2_ref, b2_ref, w3_ref, b3_ref, o_ref):
    # Layer 1: Linear + ReLU  (bf16 inputs -> f32 accumulate on the MXU)
    x = x_ref[...].astype(jnp.bfloat16)
    h1 = jnp.dot(x, w1_ref[...], preferred_element_type=jnp.float32)
    h1 = jnp.maximum(h1 + b1_ref[...], 0.0)
    # Layer 2: Linear + ReLU
    h2 = jnp.dot(h1.astype(jnp.bfloat16), w2_ref[...],
                 preferred_element_type=jnp.float32)
    h2 = jnp.maximum(h2 + b2_ref[...], 0.0)
    # Layer 3: Linear (no activation)
    out = jnp.dot(h2.astype(jnp.bfloat16), w3_ref[...],
                  preferred_element_type=jnp.float32)
    o_ref[...] = out + b3_ref[...]


def mlp_forward(x_enc, params, pred_len, *, block_b=256):
    """x_enc: (B, seq_len, enc_in) float32 -> (B, pred_len, c_out) float32."""
    w1, b1, w2, b2, w3, b3 = params
    B = x_enc.shape[0]
    x2d = x_enc.reshape(B, -1).astype(jnp.float32)  # row-major flatten == torch .view
    in_dim = x2d.shape[1]
    d1, d2, out_dim = w1.shape[1], w2.shape[1], w3.shape[1]

    # --- pad feature dims to lane-dense (multiples of 128); zero pads keep math exact ---
    d1p = _round_up(d1, LANE)
    d2p = _round_up(d2, LANE)
    outp = _round_up(out_dim, LANE)

    def pad2(a, rows, cols):
        return jnp.pad(a, ((0, rows - a.shape[0]), (0, cols - a.shape[1])))

    w1p = pad2(w1, in_dim, d1p).astype(jnp.bfloat16)
    b1p = pad2(b1, 1, d1p).astype(jnp.float32)
    w2p = pad2(w2, d1p, d2p).astype(jnp.bfloat16)
    b2p = pad2(b2, 1, d2p).astype(jnp.float32)
    w3p = pad2(w3, d2p, outp).astype(jnp.bfloat16)
    b3p = pad2(b3, 1, outp).astype(jnp.float32)

    # --- pad / tile the batch axis ---
    tb = min(block_b, _round_up(B, SUBLANE))
    b_pad = _round_up(B, tb)
    if b_pad != B:
        x2d = jnp.pad(x2d, ((0, b_pad - B), (0, 0)))
    grid = (b_pad // tb,)

    # Advisory cost estimate (FLOPs on padded dims; bytes = x + weights + out).
    flops = 2 * b_pad * (in_dim * d1p + d1p * d2p + d2p * outp)
    bytes_accessed = (b_pad * in_dim * 4
                      + (in_dim * d1p + d1p * d2p + d2p * outp) * 2
                      + (d1p + d2p + outp) * 4
                      + b_pad * outp * 4)
    cost = pl.CostEstimate(flops=flops, transcendentals=0,
                           bytes_accessed=bytes_accessed)

    out_full = pl.pallas_call(
        mlp_kernel,
        out_shape=jax.ShapeDtypeStruct((b_pad, outp), jnp.float32),
        grid_spec=pltpu.PrefetchScalarGridSpec(
            num_scalar_prefetch=0,
            grid=grid,
            in_specs=[
                pl.BlockSpec((tb, in_dim), lambda i: (i, 0)),     # x tile
                pl.BlockSpec((in_dim, d1p), lambda i: (0, 0)),    # w1 (resident)
                pl.BlockSpec((1, d1p), lambda i: (0, 0)),         # b1
                pl.BlockSpec((d1p, d2p), lambda i: (0, 0)),       # w2
                pl.BlockSpec((1, d2p), lambda i: (0, 0)),         # b2
                pl.BlockSpec((d2p, outp), lambda i: (0, 0)),      # w3
                pl.BlockSpec((1, outp), lambda i: (0, 0)),        # b3
            ],
            out_specs=pl.BlockSpec((tb, outp), lambda i: (i, 0)),
        ),
        compiler_params=pltpu.CompilerParams(
            dimension_semantics=("parallel",),
        ),
        cost_estimate=cost,
    )(x2d, w1p, b1p, w2p, b2p, w3p, b3p)

    out2d = out_full[:B, :out_dim]
    return out2d.reshape(B, pred_len, -1)  # matches torch .view(B, pred_len, -1)


def init_params(key, input_dim, d_model, adjusted_output_size):
    """Deterministic init mimicking nn.Linear's U(-1/sqrt(fan_in), 1/sqrt(fan_in)).
    Weights stored as (in_features, out_features); biases as (1, out_features)."""
    ks = jax.random.split(key, 6)

    def lin(kw, kb, fan_in, fan_out):
        bound = 1.0 / jnp.sqrt(fan_in)
        w = jax.random.uniform(kw, (fan_in, fan_out), jnp.float32, -bound, bound)
        b = jax.random.uniform(kb, (1, fan_out), jnp.float32, -bound, bound)
        return w, b

    w1, b1 = lin(ks[0], ks[1], input_dim, d_model)
    w2, b2 = lin(ks[2], ks[3], d_model, d_model // 2)
    w3, b3 = lin(ks[4], ks[5], d_model // 2, adjusted_output_size)
    return (w1, b1, w2, b2, w3, b3)


def reference_forward(x_enc, params, pred_len):
    """Pure-JAX reference using the same bf16-matmul / f32-accumulate recipe."""
    w1, b1, w2, b2, w3, b3 = params
    x = x_enc.reshape(x_enc.shape[0], -1)

    def lin(a, w, b):
        return jnp.dot(a.astype(jnp.bfloat16), w.astype(jnp.bfloat16),
                       preferred_element_type=jnp.float32) + b

    h = jnp.maximum(lin(x, w1, b1), 0.0)
    h = jnp.maximum(lin(h, w2, b2), 0.0)
    o = lin(h, w3, b3)
    return o.reshape(x_enc.shape[0], pred_len, -1)


if __name__ == "__main__":
    # Small config consistent with the module:
    #   enc_in=4, seq_len=8 -> input_dim=32 ; d_model=32 ; c_out=4 ; pred_len=8
    B, seq_len, enc_in = 2, 8, 4
    d_model, c_out, pred_len = 32, 4, 8
    input_dim = enc_in * seq_len
    adjusted_output_size = c_out * pred_len

    key = jax.random.PRNGKey(0)
    k_x, k_p = jax.random.split(key)

    x_enc = jax.random.normal(k_x, (B, seq_len, enc_in), jnp.float32)
    # x_mark_enc / x_dec / x_mark_dec are unused by the forecast path.
    params = init_params(k_p, input_dim, d_model, adjusted_output_size)

    out = mlp_forward(x_enc, params, pred_len)
    out = jax.block_until_ready(out)

    ref = reference_forward(x_enc, params, pred_len)
    assert out.shape == (B, pred_len, c_out), out.shape
    assert jnp.allclose(out, ref, atol=1e-4, rtol=1e-4), (
        "mismatch vs reference: max abs err = %e"
        % float(jnp.max(jnp.abs(out - ref)))
    )

    print("KERNEL_OK")
</pallas_src>

<mosaic_0001>
module attributes {stable_mosaic.version = 11 : i64} {
  func.func @mlp_kernel(%arg0: i32, %arg1: memref<8x32xf32, #tpu.memory_space<vmem>>, %arg2: memref<32x128xbf16, #tpu.memory_space<vmem>>, %arg3: memref<1x128xf32, #tpu.memory_space<vmem>>, %arg4: memref<128x128xbf16, #tpu.memory_space<vmem>>, %arg5: memref<1x128xf32, #tpu.memory_space<vmem>>, %arg6: memref<128x128xbf16, #tpu.memory_space<vmem>>, %arg7: memref<1x128xf32, #tpu.memory_space<vmem>>, %arg8: memref<8x128xf32, #tpu.memory_space<vmem>>) attributes {dimension_semantics = [#tpu.dimension_semantics<parallel>], iteration_bounds = array<i64: 1>, scalar_prefetch = 0 : i64, scratch_operands = 0 : i64, tpu.core_type = #tpu.core_type<tc>, window_params = [{transform_indices = @transform_0, window_bounds = array<i64: 8, 32>}, {pipeline_mode = #tpu.pipeline_mode<synchronous>, transform_indices = @transform_1, window_bounds = array<i64: 32, 128>}, {pipeline_mode = #tpu.pipeline_mode<synchronous>, transform_indices = @transform_2, window_bounds = array<i64: 1, 128>}, {pipeline_mode = #tpu.pipeline_mode<synchronous>, transform_indices = @transform_3, window_bounds = array<i64: 128, 128>}, {pipeline_mode = #tpu.pipeline_mode<synchronous>, transform_indices = @transform_4, window_bounds = array<i64: 1, 128>}, {pipeline_mode = #tpu.pipeline_mode<synchronous>, transform_indices = @transform_5, window_bounds = array<i64: 128, 128>}, {pipeline_mode = #tpu.pipeline_mode<synchronous>, transform_indices = @transform_6, window_bounds = array<i64: 1, 128>}, {transform_indices = @transform_7, window_bounds = array<i64: 8, 128>}]} {
    %c0 = arith.constant 0 : index
    %c0_0 = arith.constant 0 : index
    %0 = vector.load %arg1[%c0, %c0_0] : memref<8x32xf32, #tpu.memory_space<vmem>>, vector<8x32xf32>
    %1 = arith.truncf %0 : vector<8x32xf32> to vector<8x32xbf16>
    %c0_1 = arith.constant 0 : index
    %c0_2 = arith.constant 0 : index
    %2 = vector.load %arg2[%c0_1, %c0_2] : memref<32x128xbf16, #tpu.memory_space<vmem>>, vector<32x128xbf16>
    %cst = arith.constant dense<0.000000e+00> : vector<8x128xf32>
    %3 = tpu.matmul %1, %2, %cst {dimension_numbers = #tpu.dot_dimension_numbers<[1], [0], [0], [1], [0, 0, 1, 1], [], []>} : vector<8x32xbf16>, vector<32x128xbf16>, vector<8x128xf32> -> vector<8x128xf32>
    %c0_3 = arith.constant 0 : index
    %c0_4 = arith.constant 0 : index
    %4 = vector.load %arg3[%c0_3, %c0_4] : memref<1x128xf32, #tpu.memory_space<vmem>>, vector<1x128xf32>
    %5 = vector.broadcast %4 : vector<1x128xf32> to vector<8x128xf32>
    %6 = arith.addf %3, %5 : vector<8x128xf32>
    %cst_5 = arith.constant 0.000000e+00 : f32
    %7 = vector.broadcast %cst_5 : f32 to vector<8x128xf32>
    %8 = arith.maximumf %6, %7 : vector<8x128xf32>
    %9 = arith.truncf %8 : vector<8x128xf32> to vector<8x128xbf16>
    %c0_6 = arith.constant 0 : index
    %c0_7 = arith.constant 0 : index
    %10 = vector.load %arg4[%c0_6, %c0_7] : memref<128x128xbf16, #tpu.memory_space<vmem>>, vector<128x128xbf16>
    %cst_8 = arith.constant dense<0.000000e+00> : vector<8x128xf32>
    %11 = tpu.matmul %9, %10, %cst_8 {dimension_numbers = #tpu.dot_dimension_numbers<[1], [0], [0], [1], [0, 0, 1, 1], [], []>} : vector<8x128xbf16>, vector<128x128xbf16>, vector<8x128xf32> -> vector<8x128xf32>
    %c0_9 = arith.constant 0 : index
    %c0_10 = arith.constant 0 : index
    %12 = vector.load %arg5[%c0_9, %c0_10] : memref<1x128xf32, #tpu.memory_space<vmem>>, vector<1x128xf32>
    %13 = vector.broadcast %12 : vector<1x128xf32> to vector<8x128xf32>
    %14 = arith.addf %11, %13 : vector<8x128xf32>
    %cst_11 = arith.constant 0.000000e+00 : f32
    %15 = vector.broadcast %cst_11 : f32 to vector<8x128xf32>
    %16 = arith.maximumf %14, %15 : vector<8x128xf32>
    %17 = arith.truncf %16 : vector<8x128xf32> to vector<8x128xbf16>
    %c0_12 = arith.constant 0 : index
    %c0_13 = arith.constant 0 : index
    %18 = vector.load %arg6[%c0_12, %c0_13] : memref<128x128xbf16, #tpu.memory_space<vmem>>, vector<128x128xbf16>
    %cst_14 = arith.constant dense<0.000000e+00> : vector<8x128xf32>
    %19 = tpu.matmul %17, %18, %cst_14 {dimension_numbers = #tpu.dot_dimension_numbers<[1], [0], [0], [1], [0, 0, 1, 1], [], []>} : vector<8x128xbf16>, vector<128x128xbf16>, vector<8x128xf32> -> vector<8x128xf32>
    %c0_15 = arith.constant 0 : index
    %c0_16 = arith.constant 0 : index
    %20 = vector.load %arg7[%c0_15, %c0_16] : memref<1x128xf32, #tpu.memory_space<vmem>>, vector<1x128xf32>
    %21 = vector.broadcast %20 : vector<1x128xf32> to vector<8x128xf32>
    %22 = arith.addf %19, %21 : vector<8x128xf32>
    %c0_17 = arith.constant 0 : index
    %c0_18 = arith.constant 0 : index
    %23 = vector.load %arg8[%c0_17, %c0_18] : memref<8x128xf32, #tpu.memory_space<vmem>>, vector<8x128xf32>
    tpu.vector_store %arg8[%c0_17, %c0_18], %22 {strides = array<i32>} : memref<8x128xf32, #tpu.memory_space<vmem>>, vector<8x128xf32>,
    return
  }
  func.func @transform_0(%arg0: i32) -> (i32, i32) {
    %c0_i32 = arith.constant 0 : i32
    %c0_i32_0 = arith.constant 0 : i32
    return %arg0, %c0_i32 : i32, i32
  }
  func.func @transform_1(%arg0: i32) -> (i32, i32) {
    %c0_i32 = arith.constant 0 : i32
    %c0_i32_0 = arith.constant 0 : i32
    %c0_i32_1 = arith.constant 0 : i32
    return %c0_i32, %c0_i32_0 : i32, i32
  }
  func.func @transform_2(%arg0: i32) -> (i32, i32) {
    %c0_i32 = arith.constant 0 : i32
    %c0_i32_0 = arith.constant 0 : i32
    %c0_i32_1 = arith.constant 0 : i32
    return %c0_i32, %c0_i32_0 : i32, i32
  }
  func.func @transform_3(%arg0: i32) -> (i32, i32) {
    %c0_i32 = arith.constant 0 : i32
    %c0_i32_0 = arith.constant 0 : i32
    %c0_i32_1 = arith.constant 0 : i32
    return %c0_i32, %c0_i32_0 : i32, i32
  }
  func.func @transform_4(%arg0: i32) -> (i32, i32) {
    %c0_i32 = arith.constant 0 : i32
    %c0_i32_0 = arith.constant 0 : i32
    %c0_i32_1 = arith.constant 0 : i32
    return %c0_i32, %c0_i32_0 : i32, i32
  }
  func.func @transform_5(%arg0: i32) -> (i32, i32) {
    %c0_i32 = arith.constant 0 : i32
    %c0_i32_0 = arith.constant 0 : i32
    %c0_i32_1 = arith.constant 0 : i32
    return %c0_i32, %c0_i32_0 : i32, i32
  }
  func.func @transform_6(%arg0: i32) -> (i32, i32) {
    %c0_i32 = arith.constant 0 : i32
    %c0_i32_0 = arith.constant 0 : i32
    %c0_i32_1 = arith.constant 0 : i32
    return %c0_i32, %c0_i32_0 : i32, i32
  }
  func.func @transform_7(%arg0: i32) -> (i32, i32) {
    %c0_i32 = arith.constant 0 : i32
    %c0_i32_0 = arith.constant 0 : i32
    return %arg0, %c0_i32 : i32, i32
  }
}

</mosaic_0001>

<bundles_post_ra>
// kernel: tpu_custom_call.1
= control target key start
LH: loop header
LB: loop body
LE: loop exit
PB: predicated region body
PF: predicated region fallthrough
CT: control target
= control target key end

     0   :  { %12 = vsyncpa [#allocation3], 0  ;;  %s781_s0 = inlined_call_operand.hbm [shape: f32[8,32], index: 0, kind: input, shape index: {}]   ;;  %s782_s1 = inlined_call_operand.hbm [shape: bf16[32,128], index: 1, kind: input, shape index: {}]   ;;  %s783_s2 = inlined_call_operand.vmem [shape: f32[1,128], index: 2, kind: input, shape index: {}]   ;;  %s784_s3 = inlined_call_operand.hbm [shape: bf16[128,128], index: 3, kind: input, shape index: {}]   ;;  %s785_s4 = inlined_call_operand.vmem [shape: f32[1,128], index: 4, kind: input, shape index: {}]   ;;  %s786_s5 = inlined_call_operand.hbm [shape: bf16[128,128], index: 5, kind: input, shape index: {}]   ;;  %s787_s6 = inlined_call_operand.vmem [shape: f32[1,128], index: 6, kind: input, shape index: {}]   ;;  %s788_s7 = inlined_call_operand.hbm [shape: f32[8,128], index: 7, kind: output, shape index: {}]  }
   0x1   :  { %13 = vsyncpa [#allocation6], 0 }
   0x2   :  { %14 = vsyncpa [#allocation9], 0 }
   0x3   :  { %15 = vsyncpa [#allocation4], 0  ;;  %s630_s24 = smov [#allocation5]   ;;  %s512_s28 = scalar_lea.hbm %s782_s1, 256 }
   0x4   :  { %s31_s25 = sshll.u32 %s630_s24, 4  ;;  %p513_p0 = scmp.ne.s32.totalorder %s782_s1, %s512_s28  ;;  %s32_s25 = int_to_ptr.vmem [resolvable:$true] %s31_s25 }
   0x5   :  { %p516_p1 = scmp.lt.u32.totalorder %s512_s28, %s782_s1 }
   0x7   :  { %p518_p2 = pnand %p516_p1, %p513_p0 }
   0x9   :  { %521 = shalt.err (!%p518_p2)
}
   0xa   :  { %s522_s10 = scalar_lea.vmem %s32_s25, 256  ;;  %p527_p4 = scmp.lt.s32.totalorder %s32_s25, %s32_s25 }
   0xb   :  { %p523_p3 = scmp.ne.s32.totalorder %s32_s25, %s522_s10  ;;  %p528_p5 = scmp.lt.s32.totalorder %s522_s10, %s522_s10 }
   0xd   :  { %p529_p6 = por %p528_p5, %p527_p4 }
   0xf   :  { %p530_p7 = pnand %p529_p6, %p523_p3 }
  0x11   :  { %533 = shalt.err (!%p530_p7)
}
  0x12   :  { %s631_s11 = smov 64   ;;  %s632_s12 = smov 4  }
  0x13   :  { %37 = dma.hbm_to_vmem [thread:$0]  %s782_s1, 256, %s32_s25, [#allocation6], %s631_s11, %s631_s11, %s632_s12  }
  0x14   :  { %s633_s15 = smov [#allocation2]   ;;  %s634_s17 = smov [#allocation7]  }
  0x15   :  { %s22_s16 = sshll.u32 %s633_s15, 4  ;;  %s45_s18 = sshll.u32 %s634_s17, 4  ;;  %s23_s16 = int_to_ptr.vmem [resolvable:$true] %s22_s16  ;;  %s46_s18 = int_to_ptr.vmem [resolvable:$true] %s45_s18 }
  0x16   :  { %s534_s21 = scalar_lea.hbm %s781_s0, 128 }
  0x17   :  { %p535_p8 = scmp.ne.s32.totalorder %s781_s0, %s534_s21  ;;  %p538_p9 = scmp.lt.u32.totalorder %s534_s21, %s781_s0 }
  0x19   :  { %p540_p10 = pnand %p538_p9, %p535_p8 }
  0x1b   :  { %543 = shalt.err (!%p540_p10)
}
  0x1c   :  { %s544_s1 = scalar_lea.vmem %s23_s16, 128  ;;  %p549_p12 = scmp.lt.s32.totalorder %s23_s16, %s23_s16 }
  0x1d   :  { %p545_p11 = scmp.ne.s32.totalorder %s23_s16, %s544_s1  ;;  %p550_p13 = scmp.lt.s32.totalorder %s544_s1, %s544_s1 }
  0x1f   :  { %p551_p0 = por %p550_p13, %p549_p12 }
  0x21   :  { %p552_p1 = pnand %p551_p0, %p545_p11 }
  0x23   :  { %555 = shalt.err (!%p552_p1)
}
  0x24   :  { %25 = dma.hbm_to_vmem [thread:$0]  %s781_s0, 128, %s23_s16, [#allocation3]  }
  0x25   :  { %s556_s30 = scalar_lea.hbm %s784_s3, 1024 }
  0x26   :  { %p557_p2 = scmp.ne.s32.totalorder %s784_s3, %s556_s30  ;;  %p560_p3 = scmp.lt.u32.totalorder %s556_s30, %s784_s3 }
  0x28   :  { %p562_p4 = pnand %p560_p3, %p557_p2 }
  0x2a   :  { %565 = shalt.err (!%p562_p4)
}
  0x2b   :  { %s566_s14 = scalar_lea.vmem %s46_s18, 1024  ;;  %p571_p6 = scmp.lt.s32.totalorder %s46_s18, %s46_s18 }
  0x2c   :  { %p567_p5 = scmp.ne.s32.totalorder %s46_s18, %s566_s14  ;;  %p572_p7 = scmp.lt.s32.totalorder %s566_s14, %s566_s14 }
  0x2e   :  { %p573_p8 = por %p572_p7, %p571_p6 }
  0x30   :  { %p574_p9 = pnand %p573_p8, %p567_p5 }
  0x32   :  { %577 = shalt.err (!%p574_p9)
}
  0x33   :  { %51 = dma.hbm_to_vmem [thread:$0]  %s784_s3, 1024, %s46_s18, [#allocation6], %s631_s11, %s631_s11, %s632_s12  }
  0x34   :  { %s635_s16 = smov [#allocation8]   ;;  %s578_s21 = scalar_lea.hbm %s786_s5, 1024 }
  0x35   :  { %s59_s17 = sshll.u32 %s635_s16, 4  ;;  %p579_p10 = scmp.ne.s32.totalorder %s786_s5, %s578_s21  ;;  %s60_s17 = int_to_ptr.vmem [resolvable:$true] %s59_s17 }
  0x36   :  { %p582_p11 = scmp.lt.u32.totalorder %s578_s21, %s786_s5 }
  0x38   :  { %p584_p12 = pnand %p582_p11, %p579_p10 }
  0x3a   :  { %587 = shalt.err (!%p584_p12)
}
  0x3b   :  { %s588_s1 = scalar_lea.vmem %s60_s17, 1024  ;;  %p593_p0 = scmp.lt.s32.totalorder %s60_s17, %s60_s17 }
  0x3c   :  { %p589_p13 = scmp.ne.s32.totalorder %s60_s17, %s588_s1  ;;  %p594_p1 = scmp.lt.s32.totalorder %s588_s1, %s588_s1 }
  0x3e   :  { %p595_p2 = por %p594_p1, %p593_p0 }
  0x40   :  { %p596_p3 = pnand %p595_p2, %p589_p13 }
  0x42   :  { %599 = shalt.err (!%p596_p3)
}
  0x43   :  { %65 = dma.hbm_to_vmem [thread:$0]  %s786_s5, 1024, %s60_s17, [#allocation9], %s631_s11, %s631_s11, %s632_s12  }
  0x44   :  { %622 = dma.done.wait [#allocation3], 128  }
  0x45   :  { %623 = vsyncadd [#allocation3], 4294967168 }
  0x46   :  { %624 = dma.done.wait [#allocation6], 1280  }
  0x47   :  { %625 = vsyncadd [#allocation6], 4294966016 }
  0x48   :  { %626 = dma.done.wait [#allocation9], 1024  }
  0x49   :  { %627 = vsyncadd [#allocation9], 4294966272  ;;  %v636_v0 = vmov 0.0   ;;  %vm637_vm0 = vmmov 0   ;;  %v494_v1 = vld [vmem:[#allocation5] sm:$0xff]   ;;  %v495_v2 = vld [vmem:[#allocation5 + $0x8] sm:$0xff]  }
  0x4a   :  { %437 = vmatprep.subr.bf16.mxu0 %v636_v0  ;;  %441 = vmatprep.mubr.msk.bf16.mxu0 %vm637_vm0, %v636_v0  ;;  %v81_v3 = vld [vmem:[#allocation2] sm:$0xff]  ;;  %v496_v4 = vld [vmem:[#allocation7] sm:$0xff]   ;;  %vm106_vm1 = vcmask 261120   ;;  %v498_v7 = vld [vmem:[#allocation7 + $0x10] sm:$0xff]   ;;  %s638_s28 = smov [#allocation10]  }
  0x4b   :  { %445 = vmatprep.subr.bf16.mxu1 %v636_v0  ;;  %461 = vmatprep.mubr.msk.bf16.mxu1 %vm637_vm0, %v636_v0  ;;  %v82_v5 = vpack.c.bf16 %v81_v3, %v81_v3  ;;  %v497_v6 = vld [vmem:[#allocation7 + $0x8] sm:$0xff]   ;;  %v499_v8 = vld [vmem:[#allocation7 + $0x18] sm:$0xff]   ;;  %v500_v9 = vld [vmem:[#allocation7 + $0x20] sm:$0xff]   ;;  %s383_s29 = sshll.u32 %s638_s28, 4  ;;  %s384_s29 = int_to_ptr.vmem [resolvable:$true] %s383_s29 }
  0x4c   :  { %438 = vmatpush3.bf16.msra.mxu0 %v494_v1  ;;  %446 = vmatpush3.bf16.msra.mxu1 %v496_v4  ;;  %v501_v10 = vld [vmem:[#allocation7 + $0x28] sm:$0xff]   ;;  %v502_v11 = vld [vmem:[#allocation7 + $0x30] sm:$0xff]   ;;  %v503_v12 = vld [vmem:[#allocation7 + $0x38] sm:$0xff]   ;;  %p605_p5 = scmp.lt.s32.totalorder %s384_s29, %s384_s29 }
  0x4d   :  { %439 = vmatprep.subr.bf16.mxu0 %v636_v0  ;;  %447 = vmatprep.subr.bf16.mxu1 %v636_v0  ;;  %v504_v13 = vld [vmem:[#allocation8] sm:$0xff]   ;;  %v505_v14 = vld [vmem:[#allocation8 + $0x8] sm:$0xff]   ;;  %v506_v15 = vld [vmem:[#allocation8 + $0x10] sm:$0xff]  }
  0x4e   :  { %v507_v16 = vld [vmem:[#allocation8 + $0x18] sm:$0xff]   ;;  %v508_v17 = vld [vmem:[#allocation8 + $0x20] sm:$0xff]   ;;  %v509_v18 = vld [vmem:[#allocation8 + $0x28] sm:$0xff]  }
  0x4f   :  { %v394_v19 = vld [vmem:[%s783_s2] ss:$0 sm:$0xff]  ;;  %v510_v27 = vld [vmem:[#allocation8 + $0x30] sm:$0xff]   ;;  %v511_v28 = vld [vmem:[#allocation8 + $0x38] sm:$0xff]  }
  0x50   :  { %440 = vmatpush3.bf16.msra.mxu0 %v495_v2  ;;  %448 = vmatpush3.bf16.msra.mxu1 %v497_v6  ;;  %v398_v29 = vld [vmem:[%s785_s4] ss:$0 sm:$0xff]  ;;  %s600_s4 = scalar_lea.vmem %s384_s29, 128 }
  0x51   :  { %465 = vmatprep.subr.bf16.mxu0 %v636_v0  ;;  %449 = vmatprep.subr.bf16.mxu1 %v636_v0  ;;  %v407_v37 = vld [vmem:[%s787_s6] ss:$0 sm:$0xff]  ;;  %p601_p4 = scmp.ne.s32.totalorder %s384_s29, %s600_s4  ;;  %p606_p6 = scmp.lt.s32.totalorder %s600_s4, %s600_s4 }
  0x53   :  { %442 = vmatmul.mubr.msk.bf16.vlgmr.msra.gmra.mrb[0].mxu0 %vm106_vm1, %v82_v5  ;;  %p607_p7 = por %p606_p6, %p605_p5 }
  0x54   :  { %481 = vmatprep.mubr.msk.bf16.mxu0 %vm637_vm0, %v636_v0  ;;  %450 = vmatpush3.bf16.msra.mxu1 %v498_v7 }
  0x55   :  { %451 = vmatprep.subr.bf16.mxu1 %v636_v0  ;;  %466 = vmatpush3.bf16.msra.mxu0 %v504_v13  ;;  %p608_p8 = pnand %p607_p7, %p601_p4 }
  0x56   :  { %467 = vmatprep.subr.bf16.mxu0 %v636_v0 }
  0x58   :  { %452 = vmatpush3.bf16.msra.mxu1 %v499_v8 }
  0x59   :  { %453 = vmatprep.subr.bf16.mxu1 %v636_v0  ;;  %468 = vmatpush3.bf16.msra.mxu0 %v505_v14 }
  0x5a   :  { %469 = vmatprep.subr.bf16.mxu0 %v636_v0 }
  0x5c   :  { %454 = vmatpush3.bf16.msra.mxu1 %v500_v9 }
  0x5d   :  { %455 = vmatprep.subr.bf16.mxu1 %v636_v0  ;;  %470 = vmatpush3.bf16.msra.mxu0 %v506_v15 }
  0x5e   :  { %471 = vmatprep.subr.bf16.mxu0 %v636_v0 }
  0x60   :  { %456 = vmatpush3.bf16.msra.mxu1 %v501_v10 }
  0x61   :  { %457 = vmatprep.subr.bf16.mxu1 %v636_v0  ;;  %472 = vmatpush3.bf16.msra.mxu0 %v507_v16 }
  0x62   :  { %473 = vmatprep.subr.bf16.mxu0 %v636_v0 }
  0x64   :  { %458 = vmatpush3.bf16.msra.mxu1 %v502_v11 }
  0x65   :  { %459 = vmatprep.subr.bf16.mxu1 %v636_v0  ;;  %474 = vmatpush3.bf16.msra.mxu0 %v508_v17 }
  0x66   :  { %475 = vmatprep.subr.bf16.mxu0 %v636_v0 }
  0x68   :  { %460 = vmatpush3.bf16.msra.mxu1 %v503_v12 }
  0x69   :  { %476 = vmatpush3.bf16.msra.mxu0 %v509_v18 }
  0x6a   :  { %477 = vmatprep.subr.bf16.mxu0 %v636_v0 }
  0x6d   :  { %478 = vmatpush3.bf16.msra.mxu0 %v510_v27 }
  0x6e   :  { %479 = vmatprep.subr.bf16.mxu0 %v636_v0 }
  0x71   :  { %480 = vmatpush3.bf16.msra.mxu0 %v511_v28 }
 0x126   :  { %v144_v20 = vpop.f32.mrb[0].mxu0 }
 0x127   :  { %v145_v21 = vadd.f32 %v394_v19, %v144_v20  ;;  %v443_v22 = vpop.f32.mrb[1].mxu0 }
 0x128   :  { %v147_v23 = vpop.f32.mrb[2].mxu0 }
 0x129   :  { %v150_v24 = vmax.f32 %v145_v21, 0.0  ;;  %v444_v25 = vpop.f32.mrb[3].mxu0 }
 0x12b   :  { %v151_v26 = vpack.c.bf16 %v150_v24, %v150_v24 }
 0x12d   :  { %462 = vmatmul.mubr.bf16.vlgmr.msra.gmra.mrb[0].mxu1 %v151_v26 }
 0x200   :  { %v257_v30 = vpop.f32.mrb[0].mxu1 }
 0x201   :  { %v258_v31 = vadd.f32 %v398_v29, %v257_v30  ;;  %v463_v32 = vpop.f32.mrb[1].mxu1 }
 0x202   :  { %v260_v33 = vpop.f32.mrb[2].mxu1 }
 0x203   :  { %v263_v34 = vmax.f32 %v258_v31, 0.0  ;;  %v464_v35 = vpop.f32.mrb[3].mxu1 }
 0x205   :  { %v264_v36 = vpack.c.bf16 %v263_v34, %v263_v34 }
 0x207   :  { %482 = vmatmul.mubr.bf16.vlgmr.msra.gmra.mrb[4].mxu0 %v264_v36 }
 0x2da   :  { %v370_v38 = vpop.f32.mrb[4].mxu0 }
 0x2db   :  { %v371_v39 = vadd.f32 %v407_v37, %v370_v38  ;;  %v483_v40 = vpop.f32.mrb[5].mxu0 }
 0x2dc   :  { %v373_v41 = vpop.f32.mrb[6].mxu0 }
 0x2dd   :  { %376 = vst [vmem:[#allocation10] sm:$0xff] %v371_v39  ;;  %v484_v42 = vpop.f32.mrb[7].mxu0 }
 0x2de   :  { %611 = shalt.err (!%p608_p8)
}
 0x2df   :  { %s612_s6 = scalar_lea.hbm %s788_s7, 128 }
 0x2e0   :  { %p613_p9 = scmp.ne.s32.totalorder %s788_s7, %s612_s6  ;;  %p616_p10 = scmp.lt.u32.totalorder %s612_s6, %s788_s7 }
 0x2e2   :  { %p618_p11 = pnand %p616_p10, %p613_p9 }
 0x2e4   :  { %621 = shalt.err (!%p618_p11)
}
 0x2e5   :  { %386 = dma.vmem_to_hbm [thread:$0]  %s384_s29, 128, %s788_s7, [#allocation4]  }
 0x2e6   :  { %628 = dma.done.wait [#allocation4], 128  }
 0x2e7   :  { %629 = vsyncadd [#allocation4], 4294967168 }
 0x2e8   :  { %390 = vsyncpa [#allocation3], 1 }
 0x2e9   :  { %391 = vsyncpa [#allocation6], 1 }
 0x2ea   :  { %392 = vsyncpa [#allocation9], 1 }
 0x2eb   :  { %393 = vsyncpa [#allocation4], 1 }

</bundles_post_ra>
